<compile_context>
chip_gen: v7x
topology: tpu7x:2x2x1
jax: 0.10.0
libtpu: 0.0.40
codegen_flags: <defaults>
</compile_context>

<pallas_src>
import functools

import jax
import jax.numpy as jnp
from jax.experimental import pallas as pl
from jax.experimental.pallas import tpu as pltpu

_LANES = 128


def _cdiv(a, b):
    return (a + b - 1) // b


def _round_up(x, m):
    return _cdiv(x, m) * m


def _pow(base, g):
    """base ** g; integer g is unrolled into VPU multiplies (no pow/exp-log)."""
    if float(g) == int(g) and int(g) >= 0:
        gi = int(g)
        if gi == 0:
            return jnp.ones_like(base)
        out = base
        for _ in range(gi - 1):
            out = out * base
        return out
    return jnp.exp(g * jnp.log(jnp.maximum(base, 1e-30)))


def _temporal_focal_kernel(logits_ref, targets_ref, out_ref, acc_ref, carry_ref,
                           *, alpha, gamma, inv_n, w_temp, n, n_classes,
                           tile_rows):
    i = pl.program_id(0)
    nt = pl.num_programs(0)

    @pl.when(i == 0)
    def _init():
        acc_ref[...] = jnp.zeros_like(acc_ref)
        carry_ref[...] = jnp.zeros_like(carry_ref)

    t = targets_ref[...].astype(jnp.int32)                 # (tile_rows, 128)
    is_min = (t == 1)

    if n_classes == 2:
        # Sigmoid/softplus fast path: exact same math as softmax CE for C==2,
        # but only 3 transcendentals per sample and no reciprocal/one-hot.
        x0 = logits_ref[0].astype(jnp.float32)
        x1 = logits_ref[1].astype(jnp.float32)
        margin = x1 - x0
        u = jnp.where(is_min, margin, -margin)             # target-signed margin
        # ce = softplus(-u) = max(-u, 0) + log(1 + exp(-|u|))   (stable)
        ce = jnp.maximum(-u, 0.0) + jnp.log(1.0 + jnp.exp(-jnp.abs(u)))
        pt = jnp.exp(-ce)                                  # p_target
        p1 = jnp.where(is_min, pt, 1.0 - pt)               # class-1 probability
    else:
        # General-C softmax over per-class planes: pure elementwise across
        # planes, no cross-lane reductions.
        xs = [logits_ref[c].astype(jnp.float32) for c in range(n_classes)]
        m = xs[0]
        for c in range(1, n_classes):
            m = jnp.maximum(m, xs[c])
        zs = [x - m for x in xs]
        es = [jnp.exp(z) for z in zs]
        s = es[0]
        for c in range(1, n_classes):
            s = s + es[c]
        inv_s = pl.reciprocal(s, approx=True)              # EUP vrcp (free slot)
        log_s = jnp.log(s)
        z_t = jnp.where(t == 0, zs[0], 0.0)
        e_t = jnp.where(t == 0, es[0], 0.0)
        for c in range(1, n_classes):
            sel = (t == c)
            z_t = jnp.where(sel, zs[c], z_t)
            e_t = jnp.where(sel, es[c], e_t)
        ce = log_s - z_t                                   # cross entropy
        pt = e_t * inv_s                                   # p_target
        p1 = es[1] * inv_s                                 # class-1 probability

    focal = alpha * _pow(1.0 - pt, gamma) * ce
    focal_w = focal * (1.0 + is_min.astype(jnp.float32))

    # ---- temporal |p1[k] - p1[k-1]| with samples on the lane axis -----------
    row = jax.lax.broadcasted_iota(jnp.int32, (tile_rows, _LANES), 0)
    lane = jax.lax.broadcasted_iota(jnp.int32, (tile_rows, _LANES), 1)
    sample = (i * tile_rows + row) * _LANES + lane         # global sample index

    prev_in_row = pltpu.roll(p1, shift=1, axis=1)          # p1[r, l-1] (wraps l=0)
    prev_row_up = pltpu.roll(prev_in_row, shift=1, axis=0)  # p1[r-1, 127] at lane 0
    # carry_ref (from the PREVIOUS tile) supplies p1 of the sample just before
    # this tile at (row 0, lane 0); read it before it is overwritten below.
    prev_lane0 = jnp.where(row == 0, carry_ref[...], prev_row_up)
    prev = jnp.where(lane == 0, prev_lane0, prev_in_row)
    d = jnp.abs(p1 - prev)

    # Seam carry for the next tile: p1 of this tile's last sample sits at
    # prev_in_row[last_row, 0]; keep the whole (1,128) row (only lane 0 is used).
    carry_ref[...] = prev_in_row[tile_rows - 1:tile_rows, :]

    valid = sample < n                                     # drop end padding
    valid_d = jnp.logical_and(sample >= 1, valid)          # n-1 temporal diffs
    acc_ref[...] += (jnp.where(valid, focal_w, 0.0) * inv_n
                     + jnp.where(valid_d, d, 0.0) * w_temp)

    @pl.when(i == nt - 1)
    def _finalize():
        total = jnp.sum(acc_ref[...], axis=0, keepdims=True)   # (1, 128)
        out_ref[...] = jnp.sum(total, axis=1, keepdims=True)   # (1, 1)


def make_temporal_focal_loss(alpha=0.25, gamma=2.0, temporal_weight=0.2,
                             max_tile_rows=1024):
    alpha = float(alpha)
    gamma = float(gamma)
    temporal_weight = float(temporal_weight)

    def loss_fn(logits, targets):
        n, c = logits.shape
        assert c >= 2, "TemporalFocalLoss needs >= 2 classes (minority = class 1)"

        # ---- lane-dense repack: samples on the 128-lane axis ----------------
        dtype_bytes = jnp.dtype(logits.dtype).itemsize
        # Cap the logits block at ~4 MiB so double-buffered VMEM stays far
        # below every generation's budget (v7x: 64 MiB physical).
        cap = max(32, (4 * 2**20) // (c * _LANES * dtype_bytes))
        rows_needed = _cdiv(n, _LANES)
        tile_rows = min(max_tile_rows, cap, _round_up(rows_needed, 32))
        tile_rows = max(32, (tile_rows // 32) * 32)
        num_tiles = _cdiv(rows_needed, tile_rows)
        rows = num_tiles * tile_rows
        n_pad = rows * _LANES

        lp = jnp.pad(logits, ((0, n_pad - n), (0, 0)))
        planes = lp.T.reshape(c, rows, _LANES)             # (C, rows, 128)

        tgt_dtype = jnp.int8 if c <= 127 else jnp.int32    # shrink targets DMA
        tg = targets.reshape(-1).astype(tgt_dtype)
        tg = jnp.pad(tg, ((0, n_pad - n),)).reshape(rows, _LANES)

        inv_n = 1.0 / n
        w_temp = (temporal_weight / (n - 1)) if n > 1 else 0.0

        kernel = functools.partial(
            _temporal_focal_kernel,
            alpha=alpha, gamma=gamma, inv_n=inv_n, w_temp=w_temp,
            n=n, n_classes=c, tile_rows=tile_rows)

        logits_block = c * tile_rows * _LANES * dtype_bytes
        targets_block = tile_rows * _LANES * jnp.dtype(tgt_dtype).itemsize
        acc_bytes = tile_rows * _LANES * 4
        est = 2 * (logits_block + targets_block) + acc_bytes + 4 * _LANES
        vmem_limit = int(min(40 * 2**20, max(16 * 2**20, 3 * est)))

        out = pl.pallas_call(
            kernel,
            out_shape=jax.ShapeDtypeStruct((1, 1), jnp.float32),
            grid_spec=pltpu.PrefetchScalarGridSpec(
                num_scalar_prefetch=0,
                grid=(num_tiles,),
                in_specs=[
                    pl.BlockSpec((c, tile_rows, _LANES), lambda i: (0, i, 0)),
                    pl.BlockSpec((tile_rows, _LANES), lambda i: (i, 0)),
                ],
                out_specs=pl.BlockSpec((1, 1), lambda i: (0, 0)),
                scratch_shapes=[
                    pltpu.VMEM((tile_rows, _LANES), jnp.float32),  # partial sums
                    pltpu.VMEM((1, _LANES), jnp.float32),          # seam carry
                ],
            ),
            compiler_params=pltpu.CompilerParams(
                dimension_semantics=("arbitrary",),   # sequential seam carry
                vmem_limit_bytes=vmem_limit),
        )(planes, tg)
        return out[0, 0]

    return jax.jit(loss_fn)


def _reference(logits, targets, alpha=0.25, gamma=2.0, temporal_weight=0.2):
    """Plain-JAX reference mirroring the PyTorch module."""
    logits = logits.astype(jnp.float32)
    targets = targets.reshape(-1).astype(jnp.int32)
    logp = jax.nn.log_softmax(logits, axis=1)
    ce = -jnp.take_along_axis(logp, targets[:, None], axis=1)[:, 0]
    pt = jnp.exp(-ce)
    focal = alpha * (1.0 - pt) ** gamma * ce
    probs = jax.nn.softmax(logits, axis=1)
    p1 = probs[:, 1]
    if p1.shape[0] > 1:
        temp = jnp.mean(jnp.abs(p1[1:] - p1[:-1]))
    else:
        temp = jnp.float32(0.0)
    is_min = (targets == 1).astype(jnp.float32)
    wf = jnp.mean(focal * (1.0 + is_min))
    return wf + temporal_weight * temp


if __name__ == "__main__":
    key = jax.random.PRNGKey(0)
    k1, k2, k3, k4, k5, k6 = jax.random.split(key, 6)

    # --- primary: small binary problem (module's intended use) ---------------
    N, C = 40, 2
    logits = jax.random.normal(k1, (N, C), dtype=jnp.float32)
    targets = jax.random.bernoulli(k2, p=0.25, shape=(N,)).astype(jnp.int32)
    loss_fn = make_temporal_focal_loss(alpha=0.25, gamma=2.0, temporal_weight=0.2)
    out = jax.block_until_ready(loss_fn(logits, targets))
    ref = _reference(logits, targets)
    assert jnp.allclose(out, ref, atol=1e-5, rtol=1e-5), (out, ref)

    # --- multi-tile: exercises the cross-tile temporal seam + ragged tail ----
    N2 = 5000
    logits2 = jax.random.normal(k3, (N2, C), dtype=jnp.float32)
    targets2 = jax.random.bernoulli(k4, p=0.25, shape=(N2,)).astype(jnp.int32)
    loss_small_tiles = make_temporal_focal_loss(max_tile_rows=32)  # 2 tiles of 32x128
    out2 = jax.block_until_ready(loss_small_tiles(logits2, targets2))
    ref2 = _reference(logits2, targets2)
    assert jnp.allclose(out2, ref2, atol=1e-5, rtol=1e-5), (out2, ref2)

    # --- bf16 logits stay bf16 in HBM (half the DMA bytes) -------------------
    logits2_bf16 = logits2.astype(jnp.bfloat16)
    out3 = jax.block_until_ready(loss_small_tiles(logits2_bf16, targets2))
    ref3 = _reference(logits2_bf16.astype(jnp.float32), targets2)
    assert jnp.allclose(out3, ref3, atol=1e-4, rtol=1e-4), (out3, ref3)

    # --- general-C softmax path (approx reciprocal => looser tolerance) ------
    N4, C4 = 1000, 3
    logits4 = jax.random.normal(k5, (N4, C4), dtype=jnp.float32)
    targets4 = jax.random.randint(k6, (N4,), 0, C4, dtype=jnp.int32)
    out4 = jax.block_until_ready(loss_fn(logits4, targets4))
    ref4 = _reference(logits4, targets4)
    assert jnp.allclose(out4, ref4, atol=2e-3, rtol=2e-3), (out4, ref4)

    print("KERNEL_OK")
</pallas_src>

<mosaic_0001>
module attributes {stable_mosaic.version = 11 : i64} {
  func.func @_temporal_focal_kernel(%arg0: i32, %arg1: memref<2x32x128xf32, #tpu.memory_space<vmem>>, %arg2: memref<32x128xi8, #tpu.memory_space<vmem>>, %arg3: memref<1x1xf32, #tpu.memory_space<vmem>>, %arg4: memref<32x128xf32, #tpu.memory_space<vmem>>, %arg5: memref<1x128xf32, #tpu.memory_space<vmem>>) attributes {dimension_semantics = [#tpu.dimension_semantics<arbitrary>], iteration_bounds = array<i64: 1>, scalar_prefetch = 0 : i64, scratch_operands = 2 : i64, tpu.core_type = #tpu.core_type<tc>, window_params = [{transform_indices = @transform_0, window_bounds = array<i64: 2, 32, 128>}, {transform_indices = @transform_1, window_bounds = array<i64: 32, 128>}, {pipeline_mode = #tpu.pipeline_mode<synchronous>, transform_indices = @transform_2, window_bounds = array<i64: 1, 1>}]} {
    %c0_i32 = arith.constant 0 : i32
    %0 = arith.cmpi eq, %arg0, %c0_i32 : i32
    %1 = arith.extui %0 : i1 to i32
    %c0_i32_0 = arith.constant 0 : i32
    %2 = arith.cmpi ne, %1, %c0_i32_0 : i32
    scf.if %2 {
      %cst_35 = arith.constant 0.000000e+00 : f32
      %87 = vector.broadcast %cst_35 : f32 to vector<32x128xf32>
      %c0_36 = arith.constant 0 : index
      %c0_37 = arith.constant 0 : index
      %88 = vector.load %arg4[%c0_36, %c0_37] : memref<32x128xf32, #tpu.memory_space<vmem>>, vector<32x128xf32>
      tpu.vector_store %arg4[%c0_36, %c0_37], %87 {strides = array<i32>} : memref<32x128xf32, #tpu.memory_space<vmem>>, vector<32x128xf32>,
      %cst_38 = arith.constant 0.000000e+00 : f32
      %89 = vector.broadcast %cst_38 : f32 to vector<1x128xf32>
      %c0_39 = arith.constant 0 : index
      %c0_40 = arith.constant 0 : index
      %90 = vector.load %arg5[%c0_39, %c0_40] : memref<1x128xf32, #tpu.memory_space<vmem>>, vector<1x128xf32>
      tpu.vector_store %arg5[%c0_39, %c0_40], %89 {strides = array<i32>} : memref<1x128xf32, #tpu.memory_space<vmem>>, vector<1x128xf32>,
    } else {
    }
    %c0 = arith.constant 0 : index
    %c0_1 = arith.constant 0 : index
    %3 = vector.load %arg2[%c0, %c0_1] : memref<32x128xi8, #tpu.memory_space<vmem>>, vector<32x128xi8>
    %4 = arith.extsi %3 : vector<32x128xi8> to vector<32x128xi32>
    %c1_i32 = arith.constant 1 : i32
    %5 = vector.broadcast %c1_i32 : i32 to vector<32x128xi32>
    %6 = arith.cmpi eq, %4, %5 : vector<32x128xi32>
    %c0_2 = arith.constant 0 : index
    %c0_3 = arith.constant 0 : index
    %c0_4 = arith.constant 0 : index
    %7 = vector.load %arg1[%c0_2, %c0_3, %c0_4] : memref<2x32x128xf32, #tpu.memory_space<vmem>>, vector<1x32x128xf32>
    %8 = vector.shape_cast %7 : vector<1x32x128xf32> to vector<32x128xf32>
    %c1 = arith.constant 1 : index
    %c0_5 = arith.constant 0 : index
    %c0_6 = arith.constant 0 : index
    %9 = vector.load %arg1[%c1, %c0_5, %c0_6] : memref<2x32x128xf32, #tpu.memory_space<vmem>>, vector<1x32x128xf32>
    %10 = vector.shape_cast %9 : vector<1x32x128xf32> to vector<32x128xf32>
    %11 = arith.subf %10, %8 : vector<32x128xf32>
    %cst = arith.constant 0.000000e+00 : f32
    %12 = vector.broadcast %cst : f32 to vector<32x128xf32>
    %13 = arith.subf %12, %11 : vector<32x128xf32>
    %14 = arith.select %6, %11, %13 : vector<32x128xi1>, vector<32x128xf32>
    %cst_7 = arith.constant 0.000000e+00 : f32
    %15 = vector.broadcast %cst_7 : f32 to vector<32x128xf32>
    %16 = arith.subf %15, %14 : vector<32x128xf32>
    %cst_8 = arith.constant 0.000000e+00 : f32
    %17 = vector.broadcast %cst_8 : f32 to vector<32x128xf32>
    %18 = arith.maximumf %16, %17 : vector<32x128xf32>
    %19 = math.absf %14 : vector<32x128xf32>
    %cst_9 = arith.constant 0.000000e+00 : f32
    %20 = vector.broadcast %cst_9 : f32 to vector<32x128xf32>
    %21 = arith.subf %20, %19 : vector<32x128xf32>
    %22 = math.exp %21 : vector<32x128xf32>
    %cst_10 = arith.constant 1.000000e+00 : f32
    %23 = vector.broadcast %cst_10 : f32 to vector<32x128xf32>
    %24 = arith.addf %23, %22 : vector<32x128xf32>
    %25 = math.log %24 : vector<32x128xf32>
    %26 = arith.addf %18, %25 : vector<32x128xf32>
    %cst_11 = arith.constant 0.000000e+00 : f32
    %27 = vector.broadcast %cst_11 : f32 to vector<32x128xf32>
    %28 = arith.subf %27, %26 : vector<32x128xf32>
    %29 = math.exp %28 : vector<32x128xf32>
    %cst_12 = arith.constant 1.000000e+00 : f32
    %30 = vector.broadcast %cst_12 : f32 to vector<32x128xf32>
    %31 = arith.subf %30, %29 : vector<32x128xf32>
    %32 = arith.select %6, %29, %31 : vector<32x128xi1>, vector<32x128xf32>
    %cst_13 = arith.constant 1.000000e+00 : f32
    %33 = vector.broadcast %cst_13 : f32 to vector<32x128xf32>
    %34 = arith.subf %33, %29 : vector<32x128xf32>
    %35 = arith.mulf %34, %34 : vector<32x128xf32>
    %cst_14 = arith.constant 2.500000e-01 : f32
    %36 = vector.broadcast %cst_14 : f32 to vector<32x128xf32>
    %37 = arith.mulf %36, %35 : vector<32x128xf32>
    %38 = arith.mulf %37, %26 : vector<32x128xf32>
    %39 = arith.extui %6 : vector<32x128xi1> to vector<32x128xi32>
    %40 = arith.sitofp %39 : vector<32x128xi32> to vector<32x128xf32>
    %cst_15 = arith.constant 1.000000e+00 : f32
    %41 = vector.broadcast %cst_15 : f32 to vector<32x128xf32>
    %42 = arith.addf %41, %40 : vector<32x128xf32>
    %43 = arith.mulf %38, %42 : vector<32x128xf32>
    %44 = tpu.iota {dimensions = array<i32: 0>} : vector<32x128xi32>
    %45 = tpu.iota {dimensions = array<i32: 1>} : vector<32x128xi32>
    %c32_i32 = arith.constant 32 : i32
    %46 = arith.muli %arg0, %c32_i32 : i32
    %47 = vector.broadcast %46 : i32 to vector<32x128xi32>
    %48 = arith.addi %47, %44 : vector<32x128xi32>
    %c128_i32 = arith.constant 128 : i32
    %49 = vector.broadcast %c128_i32 : i32 to vector<32x128xi32>
    %50 = arith.muli %48, %49 : vector<32x128xi32>
    %51 = arith.addi %50, %45 : vector<32x128xi32>
    %c1_i32_16 = arith.constant 1 : i32
    %52 = tpu.dynamic_rotate %32 by %c1_i32_16 dim 1 : vector<32x128xf32>, i32 -> vector<32x128xf32>
    %c1_i32_17 = arith.constant 1 : i32
    %53 = tpu.dynamic_rotate %52 by %c1_i32_17 dim 0 : vector<32x128xf32>, i32 -> vector<32x128xf32>
    %c0_i32_18 = arith.constant 0 : i32
    %54 = vector.broadcast %c0_i32_18 : i32 to vector<32x128xi32>
    %55 = arith.cmpi eq, %44, %54 : vector<32x128xi32>
    %c0_19 = arith.constant 0 : index
    %c0_20 = arith.constant 0 : index
    %56 = vector.load %arg5[%c0_19, %c0_20] : memref<1x128xf32, #tpu.memory_space<vmem>>, vector<1x128xf32>
    %57 = vector.shape_cast %56 : vector<1x128xf32> to vector<1x128xf32>
    %58 = vector.broadcast %57 : vector<1x128xf32> to vector<32x128xf32>
    %59 = arith.select %55, %58, %53 : vector<32x128xi1>, vector<32x128xf32>
    %c0_i32_21 = arith.constant 0 : i32
    %60 = vector.broadcast %c0_i32_21 : i32 to vector<32x128xi32>
    %61 = arith.cmpi eq, %45, %60 : vector<32x128xi32>
    %62 = arith.select %61, %59, %52 : vector<32x128xi1>, vector<32x128xf32>
    %63 = arith.subf %32, %62 : vector<32x128xf32>
    %64 = math.absf %63 : vector<32x128xf32>
    %65 = vector.extract_strided_slice %52 {offsets = [31, 0], sizes = [1, 128], strides = [1, 1]} : vector<32x128xf32> to vector<1x128xf32>
    %c0_22 = arith.constant 0 : index
    %c0_23 = arith.constant 0 : index
    %66 = vector.load %arg5[%c0_22, %c0_23] : memref<1x128xf32, #tpu.memory_space<vmem>>, vector<1x128xf32>
    tpu.vector_store %arg5[%c0_22, %c0_23], %65 {strides = array<i32>} : memref<1x128xf32, #tpu.memory_space<vmem>>, vector<1x128xf32>,
    %c40_i32 = arith.constant 40 : i32
    %67 = vector.broadcast %c40_i32 : i32 to vector<32x128xi32>
    %68 = arith.cmpi slt, %51, %67 : vector<32x128xi32>
    %c1_i32_24 = arith.constant 1 : i32
    %69 = vector.broadcast %c1_i32_24 : i32 to vector<32x128xi32>
    %70 = arith.cmpi sge, %51, %69 : vector<32x128xi32>
    %71 = arith.andi %70, %68 : vector<32x128xi1>
    %c0_25 = arith.constant 0 : index
    %c0_26 = arith.constant 0 : index
    %72 = vector.load %arg4[%c0_25, %c0_26] : memref<32x128xf32, #tpu.memory_space<vmem>>, vector<32x128xf32>
    %cst_27 = arith.constant 0.000000e+00 : f32
    %73 = vector.broadcast %cst_27 : f32 to vector<32x128xf32>
    %74 = arith.select %68, %43, %73 : vector<32x128xi1>, vector<32x128xf32>
    %cst_28 = arith.constant 2.500000e-02 : f32
    %75 = vector.broadcast %cst_28 : f32 to vector<32x128xf32>
    %76 = arith.mulf %74, %75 : vector<32x128xf32>
    %cst_29 = arith.constant 0.000000e+00 : f32
    %77 = vector.broadcast %cst_29 : f32 to vector<32x128xf32>
    %78 = arith.select %71, %64, %77 : vector<32x128xi1>, vector<32x128xf32>
    %cst_30 = arith.constant 0.00512820529 : f32
    %79 = vector.broadcast %cst_30 : f32 to vector<32x128xf32>
    %80 = arith.mulf %78, %79 : vector<32x128xf32>
    %81 = arith.addf %76, %80 : vector<32x128xf32>
    %82 = arith.addf %72, %81 : vector<32x128xf32>
    %c0_31 = arith.constant 0 : index
    %c0_32 = arith.constant 0 : index
    %83 = vector.load %arg4[%c0_31, %c0_32] : memref<32x128xf32, #tpu.memory_space<vmem>>, vector<32x128xf32>
    tpu.vector_store %arg4[%c0_31, %c0_32], %82 {strides = array<i32>} : memref<32x128xf32, #tpu.memory_space<vmem>>, vector<32x128xf32>,
    %c0_i32_33 = arith.constant 0 : i32
    %84 = arith.cmpi eq, %arg0, %c0_i32_33 : i32
    %85 = arith.extui %84 : i1 to i32
    %c0_i32_34 = arith.constant 0 : i32
    %86 = arith.cmpi ne, %85, %c0_i32_34 : i32
    scf.if %86 {
      %c0_35 = arith.constant 0 : index
      %c0_36 = arith.constant 0 : index
      %87 = vector.load %arg4[%c0_35, %c0_36] : memref<32x128xf32, #tpu.memory_space<vmem>>, vector<32x128xf32>
      %cst_37 = arith.constant dense<0.000000e+00> : vector<128xf32>
      %88 = vector.multi_reduction <add>, %87, %cst_37 [0] : vector<32x128xf32> to vector<128xf32>
      %89 = vector.shape_cast %88 : vector<128xf32> to vector<1x128xf32>
      %cst_38 = arith.constant dense<0.000000e+00> : vector<1xf32>
      %90 = vector.multi_reduction <add>, %89, %cst_38 [1] : vector<1x128xf32> to vector<1xf32>
      %91 = vector.shape_cast %90 : vector<1xf32> to vector<1x1xf32>
      %c0_39 = arith.constant 0 : index
      %c0_40 = arith.constant 0 : index
      %92 = vector.load %arg3[%c0_39, %c0_40] : memref<1x1xf32, #tpu.memory_space<vmem>>, vector<1x1xf32>
      tpu.vector_store %arg3[%c0_39, %c0_40], %91 {strides = array<i32>} : memref<1x1xf32, #tpu.memory_space<vmem>>, vector<1x1xf32>,
    } else {
    }
    return
  }
  func.func @transform_0(%arg0: i32) -> (i32, i32, i32) {
    %c0_i32 = arith.constant 0 : i32
    %c0_i32_0 = arith.constant 0 : i32
    %c0_i32_1 = arith.constant 0 : i32
    return %c0_i32, %arg0, %c0_i32_0 : i32, i32, i32
  }
  func.func @transform_1(%arg0: i32) -> (i32, i32) {
    %c0_i32 = arith.constant 0 : i32
    %c0_i32_0 = arith.constant 0 : i32
    return %arg0, %c0_i32 : i32, i32
  }
  func.func @transform_2(%arg0: i32) -> (i32, i32) {
    %c0_i32 = arith.constant 0 : i32
    %c0_i32_0 = arith.constant 0 : i32
    %c0_i32_1 = arith.constant 0 : i32
    return %c0_i32, %c0_i32_0 : i32, i32
  }
}

</mosaic_0001>

<bundles_post_ra>
// kernel: loss_fn.1
= control target key start
LH: loop header
LB: loop body
LE: loop exit
PB: predicated region body
PF: predicated region fallthrough
CT: control target
= control target key end

     0   :  { %v344_v5 = vmov 0.0   ;;  %s515_s0 = inlined_call_operand.vmem [shape: f32[2,32,128], index: 0, kind: input, shape index: {}]   ;;  %s516_s1 = inlined_call_operand.vmem [shape: s8[32,128], index: 1, kind: input, shape index: {}]   ;;  %s517_s2 = inlined_call_operand.hbm [shape: f32[1,1], index: 2, kind: output, shape index: {}]  }
   0x1   :  { %v21_v0 = vld [vmem:[%s516_s1] sm:$0xff]  ;;  %v31_v1 = vld [vmem:[%s515_s0 + $0x8] sm:$0xff]  ;;  %20 = vst [vmem:[#allocation3] sm:$0x1] %v344_v5  ;;  %v32_v10 = vld [vmem:[%s515_s0 + $0x10] sm:$0xff] }
   0x2   :  { %v285_v2 = vld [vmem:[%s515_s0 + $0x28] sm:$0xff]  ;;  %v23_v3 = vunpack.c.1.s8 %v21_v0  ;;  %v22_v6 = vunpack.c.0.s8 %v21_v0  ;;  %v30_v7 = vld [vmem:[%s515_s0] sm:$0xff]  ;;  %v286_v11 = vld [vmem:[%s515_s0 + $0x30] sm:$0xff]  ;;  %v24_v15 = vunpack.c.2.s8 %v21_v0 }
   0x3   :  { %v40_v4 = vsub.f32 %v285_v2, %v31_v1  ;;  %v284_v8 = vld [vmem:[%s515_s0 + $0x20] sm:$0xff] }
   0x4   :  { %v39_v9 = vsub.f32 %v284_v8, %v30_v7  ;;  %vm383_vm0 = vcmp.eq.s32.totalorder %v23_v3, 1  ;;  %vm387_vm1 = vcmp.eq.s32.totalorder %v22_v6, 1 }
   0x5   :  { %v44_v13 = vsub.f32 0.0, %v40_v4 }
   0x6   :  { %7 = vsyncpa [#allocation5], 0  ;;  %v393_v16 = vsel %vm383_vm0, 1.0, %v344_v5  ;;  %v43_v17 = vsub.f32 0.0, %v39_v9  ;;  %v399_v19 = vsel %vm387_vm1, 1.0, %v344_v5  ;;  %v41_v20 = vsub.f32 %v286_v11, %v32_v10  ;;  %v33_v29 = vld [vmem:[%s515_s0 + $0x18] sm:$0xff] }
   0x7   :  { %v48_v18 = vsel %vm383_vm0, %v40_v4, %v44_v13  ;;  %vm403_vm2 = vcmp.eq.s32.totalorder %v24_v15, 1  ;;  %v25_v27 = vunpack.c.3.s8 %v21_v0  ;;  %v287_v30 = vld [vmem:[%s515_s0 + $0x38] sm:$0xff]  ;;  %s345_s0 = smov 1   ;;  %v131_v12 = vadd.f32 1.0, %v399_v19  ;;  %s346_s26 = smov [#allocation4]  }
   0x8   :  { %v60_v21 = vand.u32 2147483647, %v48_v18  ;;  %v47_v22 = vsel %vm387_vm1, %v39_v9, %v43_v17  ;;  %v45_v26 = vsub.f32 0.0, %v41_v20  ;;  %v417_v35 = vsel %vm403_vm2, 1.0, %v344_v5  ;;  %s276_s27 = sshll.u32 %s346_s26, 4  ;;  %s277_s27 = int_to_ptr.vmem [resolvable:$true] %s276_s27 }
   0x9   :  { %v59_v23 = vand.u32 2147483647, %v47_v22  ;;  %vm419_vm3 = vcmp.eq.s32.totalorder %v25_v27, 1  ;;  %v42_v37 = vsub.f32 %v287_v30, %v33_v29  ;;  %v52_v52 = vsub.f32 0.0, %v48_v18  ;;  %s320_s28 = scalar_lea.vmem %s277_s27, 16  ;;  %s324_s29 = scalar_lea.vmem %s277_s27, 32 }
   0xa   :  { %v64_v25 = vsub.f32 0.0, %v60_v21  ;;  %v49_v32 = vsel %vm403_vm2, %v41_v20, %v45_v26  ;;  %v425_v39 = vsel %vm419_vm3, 1.0, %v344_v5  ;;  %v51_v53 = vsub.f32 0.0, %v47_v22  ;;  %p321_p0 = scmp.ne.s32.totalorder %s277_s27, %s320_s28  ;;  %p325_p1 = scmp.lt.s32.totalorder %s277_s27, %s277_s27 }
   0xb   :  { %v63_v28 = vsub.f32 0.0, %v59_v23  ;;  %v61_v34 = vand.u32 2147483647, %v49_v32  ;;  %v46_v40 = vsub.f32 0.0, %v42_v37  ;;  %v56_v55 = vmax.f32 %v52_v52, 0.0  ;;  %p326_p2 = scmp.lt.s32.totalorder %s324_s29, %s320_s28 }
   0xc   :  { %v69_v31 = vmul.f32 1.442695, %v64_v25  ;;  %v55_v58 = vmax.f32 %v51_v53, 0.0  ;;  %v53_v59 = vsub.f32 0.0, %v49_v32  ;;  %v139_v53 = vlaneseq }
   0xd   :  { %v67_v33 = vmul.f32 1.442695, %v63_v28  ;;  %v65_v38 = vsub.f32 0.0, %v61_v34  ;;  %v50_v42 = vsel %vm419_vm3, %v42_v37, %v46_v40  ;;  %p327_p3 = por %p326_p2, %p325_p1 }
   0xe   :  { %296 = vpow2.f32 %v69_v31  ;;  %v62_v43 = vand.u32 2147483647, %v50_v42  ;;  %v57_v1 = vmax.f32 %v53_v59, 0.0  ;;  %v54_v6 = vsub.f32 0.0, %v50_v42 }
   0xf   :  { %298 = vpow2.f32 %v67_v33  ;;  %v71_v41 = vmul.f32 1.442695, %v65_v38  ;;  %v132_v33 = vadd.f32 1.0, %v393_v16  ;;  %p328_p4 = pnand %p327_p3, %p321_p0 }
  0x10   :  { %v66_v44 = vsub.f32 0.0, %v62_v43  ;;  %v58_v11 = vmax.f32 %v54_v6, 0.0 }
  0x11   :  { %300 = vpow2.f32 %v71_v41 }
  0x12   :  { %v73_v45 = vmul.f32 1.442695, %v66_v44  ;;  %v133_v44 = vadd.f32 1.0, %v417_v35  ;;  %v140_v35 = vshrl.u32 %v139_v53, 7 }
  0x14   :  { %302 = vpow2.f32 %v73_v45  ;;  %vm172_vm4 = vcmp.lt.s32.totalorder %v140_v35, 1  ;;  %v142_v36 = vadd.s32 16, %v140_v35  ;;  %vm177_vm8 = vcmp.eq.s32.totalorder %v140_v35, 0 }
  0x18   :  { %v297_v46 = vpop.eup %296 }
  0x19   :  { %v299_v47 = vpop.eup %298  ;;  %v76_v48 = vadd.f32 1.0, %v297_v46 }
  0x1a   :  { %v75_v49 = vadd.f32 1.0, %v299_v47 }
  0x1b   :  { %304 = vlog2.f32 %v76_v48  ;;  %v301_v50 = vpop.eup %300 }
  0x1c   :  { %306 = vlog2.f32 %v75_v49  ;;  %v77_v51 = vadd.f32 1.0, %v301_v50  ;;  %v134_v50 = vadd.f32 1.0, %v425_v39  ;;  %v154_v39 = vmul.u32 128, %v142_v36 }
  0x1e   :  { %308 = vlog2.f32 %v77_v51  ;;  %v303_v54 = vpop.eup %302 }
  0x1f   :  { %v78_v56 = vadd.f32 1.0, %v303_v54  ;;  %v141_v54 = vadd.s32 8, %v140_v35 }
  0x21   :  { %310 = vlog2.f32 %v78_v56 }
  0x25   :  { %v305_v57 = vpop.eup %304 }
  0x26   :  { %v307_v60 = vpop.eup %306  ;;  %v82_v61 = vmul.f32 0.6931472, %v305_v57 }
  0x27   :  { %v80_v62 = vmul.f32 0.6931472, %v307_v60  ;;  %v143_v60 = vadd.s32 24, %v140_v35 }
  0x28   :  { %v88_v63 = vadd.f32 %v82_v61, %v56_v55  ;;  %v309_v2 = vpop.eup %308  ;;  %v145_v55 = vand.u32 127, %v139_v53  ;;  %v153_v61 = vmul.u32 128, %v141_v54 }
  0x29   :  { %v87_v0 = vadd.f32 %v80_v62, %v55_v58  ;;  %v84_v5 = vmul.f32 0.6931472, %v309_v2 }
  0x2a   :  { %v92_v3 = vsub.f32 0.0, %v88_v63  ;;  %vm192_vm5 = vcmp.eq.s32.totalorder %v145_v55, 0 }
  0x2b   :  { %v91_v4 = vsub.f32 0.0, %v87_v0  ;;  %v89_v9 = vadd.f32 %v84_v5, %v57_v1  ;;  %v311_v13 = vpop.eup %310 }
  0x2c   :  { %v97_v7 = vmul.f32 1.442695, %v92_v3  ;;  %v86_v17 = vmul.f32 0.6931472, %v311_v13  ;;  %v155_v3 = vmul.u32 128, %v143_v60 }
  0x2d   :  { %v95_v8 = vmul.f32 1.442695, %v91_v4  ;;  %v93_v10 = vsub.f32 0.0, %v89_v9  ;;  %v157_v4 = vadd.s32 %v153_v61, %v145_v55 }
  0x2e   :  { %312 = vpow2.f32 %v97_v7  ;;  %v90_v18 = vadd.f32 %v86_v17, %v58_v11  ;;  %v158_v7 = vadd.s32 %v154_v39, %v145_v55  ;;  %v159_v11 = vadd.s32 %v155_v3, %v145_v55 }
  0x2f   :  { %314 = vpow2.f32 %v95_v8  ;;  %v99_v15 = vmul.f32 1.442695, %v93_v10  ;;  %v292_v10 = vld [vmem:[#allocation3] ss:$0 sm:$0xff]  ;;  %vm207_vm6 = vcmp.lt.s32.totalorder %v157_v4, 40  ;;  %vm211_vm7 = vcmp.ge.s32.totalorder %v157_v4, 1 }
  0x30   :  { %v94_v20 = vsub.f32 0.0, %v90_v18  ;;  %vm208_vm10 = vcmp.lt.s32.totalorder %v158_v7, 40  ;;  %vm212_vm11 = vcmp.ge.s32.totalorder %v158_v7, 1  ;;  %vm468_vm12 = vmand %vm211_vm7, %vm207_vm6  ;;  %vm209_vm14 = vcmp.lt.s32.totalorder %v159_v11, 40 }
  0x31   :  { %316 = vpow2.f32 %v99_v15  ;;  %vm213_vm15 = vcmp.ge.s32.totalorder %v159_v11, 1 }
  0x32   :  { %v101_v21 = vmul.f32 1.442695, %v94_v20 }
  0x34   :  { %318 = vpow2.f32 %v101_v21 }
  0x38   :  { %v313_v22 = vpop.eup %312 }
  0x39   :  { %v315_v23 = vpop.eup %314  ;;  %v104_v25 = vsub.f32 1.0, %v313_v22 }
  0x3a   :  { %v103_v26 = vsub.f32 1.0, %v315_v23 }
  0x3b   :  { %v431_v27 = vsel %vm383_vm0, %v313_v22, %v104_v25  ;;  %v112_v28 = vmul.f32 %v104_v25, %v104_v25  ;;  %v317_v31 = vpop.eup %316  ;;  %vm476_vm0 = vmand %vm212_vm11, %vm208_vm10 }
  0x3c   :  { %162 = vrot.lane.b32.xlu1 %v431_v27, %s345_s0  ;;  %v436_v29 = vsel %vm387_vm1, %v315_v23, %v103_v26  ;;  %v111_v30 = vmul.f32 %v103_v26, %v103_v26  ;;  %v105_v37 = vsub.f32 1.0, %v317_v31 }
  0x3d   :  { %v116_v32 = vmul.f32 0.25, %v112_v28  ;;  %160 = vrot.lane.b32.xlu0 %v436_v29, %s345_s0 }
  0x3e   :  { %v115_v34 = vmul.f32 0.25, %v111_v30  ;;  %v443_v41 = vsel %vm403_vm2, %v317_v31, %v105_v37  ;;  %v113_v14 = vmul.f32 %v105_v37, %v105_v37  ;;  %v319_v45 = vpop.eup %318  ;;  %vm217_vm2 = vmand %vm213_vm15, %vm209_vm14 }
  0x3f   :  { %v120_v38 = vmul.f32 %v116_v32, %v88_v63  ;;  %v106_v19 = vsub.f32 1.0, %v319_v45  ;;  %v152_v63 = vmul.u32 128, %v140_v35 }
  0x40   :  { %v119_v40 = vmul.f32 %v115_v34, %v87_v0  ;;  %164 = vrot.lane.b32.xlu1 %v443_v41, %s345_s0  ;;  %v117_v16 = vmul.f32 0.25, %v113_v14 }
  0x41   :  { %v445_v42 = vmul.f32 %v132_v33, %v120_v38  ;;  %v455_v24 = vsel %vm419_vm3, %v319_v45, %v106_v19  ;;  %v114_v48 = vmul.f32 %v106_v19, %v106_v19  ;;  %v156_v6 = vadd.s32 %v152_v63, %v145_v55 }
  0x42   :  { %v448_v43 = vmul.f32 %v131_v12, %v119_v40  ;;  %v121_v46 = vmul.f32 %v117_v16, %v89_v9  ;;  %166 = vrot.lane.b32.xlu0 %v455_v24, %s345_s0  ;;  %vm268_vm3 = vcmask 0  }
  0x43   :  { %v118_v49 = vmul.f32 0.25, %v114_v48  ;;  %vm206_vm9 = vcmp.lt.s32.totalorder %v156_v6, 40  ;;  %vm210_vm13 = vcmp.ge.s32.totalorder %v156_v6, 1  ;;  %v223_v31 = vsel %vm207_vm6, %v445_v42, 0.0 }
  0x44   :  { %v451_v47 = vmul.f32 %v133_v44, %v121_v46  ;;  %vm485_vm1 = vmand %vm210_vm13, %vm206_vm9  ;;  %v222_v33 = vsel %vm206_vm9, %v448_v43, 0.0  ;;  %v227_v14 = vmul.f32 0.025, %v223_v31 }
  0x45   :  { %v122_v51 = vmul.f32 %v118_v49, %v90_v18  ;;  %v226_v42 = vmul.f32 0.025, %v222_v33 }
  0x46   :  { %v224_v38 = vsel %vm208_vm10, %v451_v47, 0.0 }
  0x47   :  { %v459_v52 = vmul.f32 %v134_v50, %v122_v51  ;;  %v228_v45 = vmul.f32 0.025, %v224_v38 }
  0x49   :  { %v225_v43 = vsel %vm209_vm14, %v459_v52, 0.0 }
  0xae   :  { %v163_v56 = vpop.permute.xlu1 %162 }
  0xaf   :  { %v169_v57 = vrot.slane %v163_v56, 7  ;;  %v161_v58 = vpop.permute.xlu0 %160 }
  0xb0   :  { %v168_v59 = vrot.slane %v161_v58, 7 }
  0xb2   :  { %v175_v62 = vsel %vm172_vm4, %v168_v59, %v169_v57  ;;  %v165_v0 = vpop.permute.xlu1 %164 }
  0xb3   :  { %v170_v1 = vrot.slane %v165_v0, 7  ;;  %v194_v2 = vsel %vm192_vm5, %v175_v62, %v163_v56 }
  0xb4   :  { %v198_v9 = vsub.f32 %v431_v27, %v194_v2  ;;  %v167_v15 = vpop.permute.xlu0 %166 }
  0xb5   :  { %v174_v5 = vsel %vm172_vm4, %v169_v57, %v170_v1  ;;  %v171_v17 = vrot.slane %v167_v15, 7  ;;  %205 = vst [vmem:[#allocation3 - $0x7] sm:$0x80] %v167_v15 }
  0xb6   :  { %v195_v8 = vsel %vm192_vm5, %v174_v5, %v165_v0  ;;  %v202_v18 = vand.u32 2147483647, %v198_v9 }
  0xb7   :  { %v199_v13 = vsub.f32 %v443_v41, %v195_v8  ;;  %v173_v21 = vsel %vm172_vm4, %v170_v1, %v171_v17  ;;  %v176_v22 = vsel %vm172_vm4, %v171_v17, %v168_v59 }
  0xb8   :  { %v188_v25 = vsel %vm177_vm8, %v292_v10, %v176_v22  ;;  %v196_v26 = vsel %vm192_vm5, %v173_v21, %v167_v15  ;;  %v231_v34 = vsel %vm468_vm12, %v202_v18, 0.0 }
  0xb9   :  { %v203_v23 = vand.u32 2147483647, %v199_v13  ;;  %v193_v28 = vsel %vm192_vm5, %v188_v25, %v161_v58  ;;  %v200_v30 = vsub.f32 %v455_v24, %v196_v26  ;;  %v235_v16 = vmul.f32 0.0051282053, %v231_v34 }
  0xba   :  { %v197_v12 = vsub.f32 %v436_v29, %v193_v28  ;;  %v229_v24 = vmul.f32 0.025, %v225_v43 }
  0xbb   :  { %v204_v37 = vand.u32 2147483647, %v200_v30  ;;  %v232_v40 = vsel %vm476_vm0, %v203_v23, 0.0  ;;  %v239_v49 = vadd.f32 %v235_v16, %v227_v14 }
  0xbc   :  { %v201_v41 = vand.u32 2147483647, %v197_v12  ;;  %v236_v46 = vmul.f32 0.0051282053, %v232_v40 }
  0xbd   :  { %v233_v29 = vsel %vm217_vm2, %v204_v37, 0.0 }
  0xbe   :  { %v230_v44 = vsel %vm485_vm1, %v201_v41, 0.0  ;;  %v237_v48 = vmul.f32 0.0051282053, %v233_v29  ;;  %v240_v50 = vadd.f32 %v236_v46, %v228_v45 }
  0xbf   :  { %v234_v19 = vmul.f32 0.0051282053, %v230_v44 }
  0xc0   :  { %v241_v53 = vadd.f32 %v237_v48, %v229_v24 }
  0xc1   :  { %v238_v47 = vadd.f32 %v234_v19, %v226_v42 }
  0xc3   :  { %v257_v51 = vadd.f32 %v239_v49, %v238_v47 }
  0xc5   :  { %v258_v35 = vadd.f32 %v257_v51, %v240_v50 }
  0xc7   :  { %v259_v54 = vadd.f32 %v258_v35, %v241_v53 }
  0xc9   :  { %v260_v55 = vrot.slane %v259_v54, 4 }
  0xcb   :  { %v261_v56 = vadd.f32 %v260_v55, %v259_v54 }
  0xcd   :  { %v262_v57 = vrot.slane %v261_v56, 2 }
  0xcf   :  { %v263_v52 = vadd.f32 %v262_v57, %v261_v56 }
  0xd1   :  { %v264_v58 = vrot.slane %v263_v52, 1 }
  0xd3   :  { %v265_v36 = vadd.f32 %v264_v58, %v263_v52 }
  0xd5   :  { %266 = vadd.xlane.f32.xlu0 %v265_v36 }
 0x162   :  { %v267_v59 = vpop.xlane.xlu0 %266 }
 0x163   :  { %269 = vst.msk [vmem:[#allocation4] sm:$0x1] %vm268_vm3, %v267_v59 }
 0x164   :  { %331 = shalt.err (!%p328_p4)
}
 0x165   :  { %s332_s4 = scalar_lea.hbm %s517_s2, 16 }
 0x166   :  { %p333_p5 = scmp.ne.s32.totalorder %s517_s2, %s332_s4  ;;  %p336_p6 = scmp.lt.u32.totalorder %s332_s4, %s517_s2 }
 0x168   :  { %p338_p7 = pnand %p336_p6, %p333_p5 }
 0x16a   :  { %341 = shalt.err (!%p338_p7)
}
 0x16b   :  { %279 = dma.vmem_to_hbm [thread:$0]  %s277_s27, 16, %s517_s2, [#allocation5]  }
 0x16c   :  { %342 = dma.done.wait [#allocation5], 16  }
 0x16d   :  { %343 = vsyncadd [#allocation5], 4294967280 }
 0x16e   :  { %283 = vsyncpa [#allocation5], 1 }

</bundles_post_ra>
